<compile_context>
chip_gen: v7x
topology: tpu7x:2x2x1
jax: 0.10.0
libtpu: 0.0.40
codegen_flags: <defaults>
</compile_context>

<pallas_src>
import functools

import jax
import jax.numpy as jnp
from jax.experimental import pallas as pl
from jax.experimental.pallas import tpu as pltpu


def generator_kernel(x_ref, w1_ref, b1_ref, w2_ref, b2_ref, o_ref, *, compute_dtype):
    # x arrives in its HBM dtype (f32); cast to the compute dtype here on the
    # VPU (free slot - this kernel is memory-bound) instead of paying a separate
    # XLA astype pass over HBM in the wrapper.
    x = x_ref[...].astype(compute_dtype)
    h = jnp.dot(x, w1_ref[...], preferred_element_type=jnp.float32) + b1_ref[...]
    h = jnp.maximum(h, 0.0)                                   # ReLU, f32 on the VPU
    # NOTE: when compute_dtype is bf16, h is intentionally re-rounded to bf16
    # before the second MXU matmul (double rounding); covered by the bf16 tolerance.
    y = jnp.dot(h.astype(compute_dtype), w2_ref[...],
                preferred_element_type=jnp.float32) + b2_ref[...]
    o_ref[...] = y.astype(o_ref.dtype)


def _pick_block_m(batch):
    """M-tile heuristic:
      * batch >= 256: split into >= 2 grid steps so both v7x TensorCores get work
        (dimension_semantics=("parallel",)); tiles rounded to 128 rows, capped at
        1024 rows.  Per-step overhead (~0.35 us) is negligible on single-TC
        v5e/v6e at these tile sizes.
      * small batch: one tile covering the whole batch (grid=(1,))."""
    if batch >= 256:
        return min(1024, ((pl.cdiv(batch, 2) + 127) // 128) * 128)
    return max(8, ((batch + 7) // 8) * 8)


def prep_generator_params(w1, b1, w2, b2, *, compute_dtype=jnp.bfloat16):
    """One-time weight prep (hoisted out of the per-call path): cast the big
    matmul operands to the compute dtype; biases stay f32 (added post-MXU)."""
    return (jnp.asarray(w1, compute_dtype), jnp.asarray(b1, jnp.float32),
            jnp.asarray(w2, compute_dtype), jnp.asarray(b2, jnp.float32))


def generator_forward(noise, w1, b1, w2, b2, *, block_m=None, out_dtype=None):
    """noise: [B, D] -> [B, D].  w1/b1/w2/b2 must come from prep_generator_params
    (pre-transposed [in, out] layout; weight dtype = compute dtype)."""
    B, D = noise.shape
    H = w1.shape[1]
    assert w1.shape == (D, H) and w2.shape == (H, D)
    assert b1.shape == (1, H) and b2.shape == (1, D)

    compute_dtype = w1.dtype
    out_dtype = noise.dtype if out_dtype is None else out_dtype

    if block_m is None:
        block_m = _pick_block_m(B)
    block_m = max(8, min(block_m, ((B + 7) // 8) * 8))
    grid = (pl.cdiv(B, block_m),)

    kernel = functools.partial(generator_kernel, compute_dtype=compute_dtype)

    # No activation padding / output slicing: the last block dim equals the full
    # feature dim D (legal even when D < 128); the masked partial-store cost at
    # small D is far cheaper than DMA-ing 128/D x the activation bytes.
    return pl.pallas_call(
        kernel,
        out_shape=jax.ShapeDtypeStruct((B, D), out_dtype),
        grid=grid,
        in_specs=[
            pl.BlockSpec((block_m, D), lambda i: (i, 0)),           # x tile (original dtype)
            pl.BlockSpec(memory_space=pltpu.MemorySpace.VMEM),      # W1 whole, single-buffered
            pl.BlockSpec(memory_space=pltpu.MemorySpace.VMEM),      # b1
            pl.BlockSpec(memory_space=pltpu.MemorySpace.VMEM),      # W2
            pl.BlockSpec(memory_space=pltpu.MemorySpace.VMEM),      # b2
        ],
        out_specs=pl.BlockSpec((block_m, D), lambda i: (i, 0)),
        compiler_params=pltpu.CompilerParams(
            dimension_semantics=("parallel",)),
    )(noise, w1, b1, w2, b2)


def init_generator_params(key, embedding_dim, hidden=128, dtype=jnp.float32):
    # Deterministic init mimicking PyTorch nn.Linear default:
    # U(-1/sqrt(fan_in), 1/sqrt(fan_in)).  Weights stored as [in, out].
    k1, k2, k3, k4 = jax.random.split(key, 4)
    bound1 = 1.0 / (embedding_dim ** 0.5)
    bound2 = 1.0 / (hidden ** 0.5)
    w1 = jax.random.uniform(k1, (embedding_dim, hidden), dtype, -bound1, bound1)
    b1 = jax.random.uniform(k2, (1, hidden), dtype, -bound1, bound1)
    w2 = jax.random.uniform(k3, (hidden, embedding_dim), dtype, -bound2, bound2)
    b2 = jax.random.uniform(k4, (1, embedding_dim), dtype, -bound2, bound2)
    return w1, b1, w2, b2


if __name__ == "__main__":
    # TODO(synk): original script loads rescal_model.pth to get embedding_dim;
    # here we pick a small synthetic embedding_dim instead.
    embedding_dim = 32
    batch = 256          # default tiling -> block_m=128, grid=(2,): both v7x TCs busy

    key = jax.random.PRNGKey(0)
    k_noise, k_params = jax.random.split(key)
    noise = jax.random.normal(k_noise, (batch, embedding_dim), dtype=jnp.float32)
    w1, b1, w2, b2 = init_generator_params(k_params, embedding_dim)

    # Plain-JAX f32 reference (same default TPU matmul precision as the kernel's
    # f32 path; tolerance below covers the remaining tiling/rounding differences).
    ref = jnp.maximum(noise @ w1 + b1, 0.0) @ w2 + b2

    # f32 compute path (weights prepped as f32): tight-ish check.
    p32 = prep_generator_params(w1, b1, w2, b2, compute_dtype=jnp.float32)
    out_f32 = generator_forward(noise, *p32)
    jax.block_until_ready(out_f32)
    assert out_f32.shape == (batch, embedding_dim)
    assert jnp.allclose(out_f32, ref, atol=1e-4), "f32 mismatch vs reference"

    # bf16 compute path (default production path): bf16 MXU operands, f32 accumulation.
    pbf = prep_generator_params(w1, b1, w2, b2, compute_dtype=jnp.bfloat16)
    out_bf16 = generator_forward(noise, *pbf)
    jax.block_until_ready(out_bf16)
    assert out_bf16.shape == (batch, embedding_dim)
    assert jnp.allclose(out_bf16, ref, atol=3e-2), "bf16 mismatch vs reference"

    print("KERNEL_OK")
</pallas_src>

<mosaic_0001>
module attributes {stable_mosaic.version = 11 : i64} {
  func.func @generator_kernel(%arg0: i32, %arg1: memref<128x32xf32, #tpu.memory_space<vmem>>, %arg2: memref<32x128xf32, #tpu.memory_space<vmem>>, %arg3: memref<1x128xf32, #tpu.memory_space<vmem>>, %arg4: memref<128x32xf32, #tpu.memory_space<vmem>>, %arg5: memref<1x32xf32, #tpu.memory_space<vmem>>, %arg6: memref<128x32xf32, #tpu.memory_space<vmem>>) attributes {dimension_semantics = [#tpu.dimension_semantics<parallel>], iteration_bounds = array<i64: 2>, scalar_prefetch = 0 : i64, scratch_operands = 0 : i64, tpu.core_type = #tpu.core_type<tc>, window_params = [{transform_indices = @transform_0, window_bounds = array<i64: 128, 32>}, {pipeline_mode = #tpu.pipeline_mode<synchronous>, transform_indices = @transform_1, window_bounds = array<i64: 32, 128>}, {pipeline_mode = #tpu.pipeline_mode<synchronous>, transform_indices = @transform_2, window_bounds = array<i64: 1, 128>}, {pipeline_mode = #tpu.pipeline_mode<synchronous>, transform_indices = @transform_3, window_bounds = array<i64: 128, 32>}, {pipeline_mode = #tpu.pipeline_mode<synchronous>, transform_indices = @transform_4, window_bounds = array<i64: 1, 32>}, {transform_indices = @transform_5, window_bounds = array<i64: 128, 32>}]} {
    %c0 = arith.constant 0 : index
    %c0_0 = arith.constant 0 : index
    %0 = vector.load %arg1[%c0, %c0_0] : memref<128x32xf32, #tpu.memory_space<vmem>>, vector<128x32xf32>
    %c0_1 = arith.constant 0 : index
    %c0_2 = arith.constant 0 : index
    %1 = vector.load %arg2[%c0_1, %c0_2] : memref<32x128xf32, #tpu.memory_space<vmem>>, vector<32x128xf32>
    %cst = arith.constant dense<0.000000e+00> : vector<128x128xf32>
    %2 = tpu.matmul %0, %1, %cst {dimension_numbers = #tpu.dot_dimension_numbers<[1], [0], [0], [1], [0, 0, 1, 1], [], []>} : vector<128x32xf32>, vector<32x128xf32>, vector<128x128xf32> -> vector<128x128xf32>
    %c0_3 = arith.constant 0 : index
    %c0_4 = arith.constant 0 : index
    %3 = vector.load %arg3[%c0_3, %c0_4] : memref<1x128xf32, #tpu.memory_space<vmem>>, vector<1x128xf32>
    %4 = vector.broadcast %3 : vector<1x128xf32> to vector<128x128xf32>
    %5 = arith.addf %2, %4 : vector<128x128xf32>
    %cst_5 = arith.constant 0.000000e+00 : f32
    %6 = vector.broadcast %cst_5 : f32 to vector<128x128xf32>
    %7 = arith.maximumf %5, %6 : vector<128x128xf32>
    %c0_6 = arith.constant 0 : index
    %c0_7 = arith.constant 0 : index
    %8 = vector.load %arg4[%c0_6, %c0_7] : memref<128x32xf32, #tpu.memory_space<vmem>>, vector<128x32xf32>
    %cst_8 = arith.constant dense<0.000000e+00> : vector<128x32xf32>
    %9 = tpu.matmul %7, %8, %cst_8 {dimension_numbers = #tpu.dot_dimension_numbers<[1], [0], [0], [1], [0, 0, 1, 1], [], []>} : vector<128x128xf32>, vector<128x32xf32>, vector<128x32xf32> -> vector<128x32xf32>
    %c0_9 = arith.constant 0 : index
    %c0_10 = arith.constant 0 : index
    %10 = vector.load %arg5[%c0_9, %c0_10] : memref<1x32xf32, #tpu.memory_space<vmem>>, vector<1x32xf32>
    %11 = vector.broadcast %10 : vector<1x32xf32> to vector<128x32xf32>
    %12 = arith.addf %9, %11 : vector<128x32xf32>
    %c0_11 = arith.constant 0 : index
    %c0_12 = arith.constant 0 : index
    %13 = vector.load %arg6[%c0_11, %c0_12] : memref<128x32xf32, #tpu.memory_space<vmem>>, vector<128x32xf32>
    tpu.vector_store %arg6[%c0_11, %c0_12], %12 {strides = array<i32>} : memref<128x32xf32, #tpu.memory_space<vmem>>, vector<128x32xf32>,
    return
  }
  func.func @transform_0(%arg0: i32) -> (i32, i32) {
    %c0_i32 = arith.constant 0 : i32
    %c0_i32_0 = arith.constant 0 : i32
    return %arg0, %c0_i32 : i32, i32
  }
  func.func @transform_1(%arg0: i32) -> (i32, i32) {
    %c0_i32 = arith.constant 0 : i32
    %c0_i32_0 = arith.constant 0 : i32
    %c0_i32_1 = arith.constant 0 : i32
    return %c0_i32, %c0_i32_0 : i32, i32
  }
  func.func @transform_2(%arg0: i32) -> (i32, i32) {
    %c0_i32 = arith.constant 0 : i32
    %c0_i32_0 = arith.constant 0 : i32
    %c0_i32_1 = arith.constant 0 : i32
    return %c0_i32, %c0_i32_0 : i32, i32
  }
  func.func @transform_3(%arg0: i32) -> (i32, i32) {
    %c0_i32 = arith.constant 0 : i32
    %c0_i32_0 = arith.constant 0 : i32
    %c0_i32_1 = arith.constant 0 : i32
    return %c0_i32, %c0_i32_0 : i32, i32
  }
  func.func @transform_4(%arg0: i32) -> (i32, i32) {
    %c0_i32 = arith.constant 0 : i32
    %c0_i32_0 = arith.constant 0 : i32
    %c0_i32_1 = arith.constant 0 : i32
    return %c0_i32, %c0_i32_0 : i32, i32
  }
  func.func @transform_5(%arg0: i32) -> (i32, i32) {
    %c0_i32 = arith.constant 0 : i32
    %c0_i32_0 = arith.constant 0 : i32
    return %arg0, %c0_i32 : i32, i32
  }
}

</mosaic_0001>

<bundles_post_ra>
// kernel: tpu_custom_call.1
= control target key start
LH: loop header
LB: loop body
LE: loop exit
PB: predicated region body
PF: predicated region fallthrough
CT: control target
= control target key end

     0   :  { %s976_s18 = smov 0   ;;  %s1134_s0 = inlined_call_operand.vmem [shape: f32[256,32], index: 0, kind: input, shape index: {}]   ;;  %s1135_s1 = inlined_call_operand.vmem [shape: f32[32,128], index: 1, kind: input, shape index: {}]   ;;  %s1136_s2 = inlined_call_operand.vmem [shape: f32[1,128], index: 2, kind: input, shape index: {}]   ;;  %s1137_s3 = inlined_call_operand.vmem [shape: f32[128,32], index: 3, kind: input, shape index: {}]   ;;  %s1138_s4 = inlined_call_operand.vmem [shape: f32[1,32], index: 4, kind: input, shape index: {}]   ;;  %s1139_s5 = inlined_call_operand.vmem [shape: f32[256,32], index: 5, kind: output, shape index: {}]  }
   0x1 LB: > { %s705_s19 = sadd.s32 4294967295, %s944_s18   ;;  %p709_p0 = scmp.ge.s32.totalorder %s944_s18, 1  ;;  %s944_s18 = sphi %s976_s18, %s15_s18  }
   0x2   : > { %p188_p1 = scmp.lt.s32.totalorder %s944_s18, 3 }
   0x4   : > { %p189_p2 = pnand %p709_p0, %p188_p1 }
   0x5   : > { %v244_v0 = vld [vmem:[%s1135_s1] sm:$0xff] (!%p189_p2)  ;;  %v245_v1 = vld [vmem:[%s1135_s1 + $0x8] sm:$0xff] (!%p189_p2)  ;;  %v246_v2 = vld [vmem:[%s1135_s1 + $0x10] sm:$0xff] (!%p189_p2)  ;;  %s710_s26 = sshll.u32 (!%p189_p2), %s705_s19, 4  ;;  %vm255_vm0 = vcmask (!%p189_p2), 261120  }
   0x6   : > { %192 = sbr.rel (%p189_p2) target bundleno = 480 (0x1e0), region = 40  ;;  %v874_v3 = vpack.c.bf16 (!%p189_p2), %v245_v1, %v244_v0  ;;  %v247_v4 = vld [vmem:[%s1135_s1 + $0x18] sm:$0xff] (!%p189_p2)  ;;  %p217_p3 = scmp.lt.s32.totalorder (!%p189_p2), %s710_s26, 31  ;;  %v465_v5 = vld [vmem:[%s1137_s3] sm:$0xff] (!%p189_p2)  ;;  %v466_v6 = vld [vmem:[%s1137_s3 + $0x8] sm:$0xff] (!%p189_p2) }
   0x7   : > { %v878_v7 = vpack.c.bf16 (!%p189_p2), %v247_v4, %v246_v2  ;;  %v882_v8 = vpack.c.bf16 (!%p189_p2), %v466_v6, %v465_v5  ;;  %v467_v9 = vld [vmem:[%s1137_s3 + $0x10] sm:$0xff] (!%p189_p2)  ;;  %v468_v10 = vld [vmem:[%s1137_s3 + $0x18] sm:$0xff] (!%p189_p2)  ;;  %v469_v12 = vld [vmem:[%s1137_s3 + $0x20] sm:$0xff] (!%p189_p2) }
   0x8   : > { %875 = vmatprep.subr.bf16.mxu0 (!%p189_p2), %v874_v3  ;;  %v886_v11 = vpack.c.bf16 (!%p189_p2), %v468_v10, %v467_v9  ;;  %v470_v13 = vld [vmem:[%s1137_s3 + $0x28] sm:$0xff] (!%p189_p2)  ;;  %v471_v18 = vld [vmem:[%s1137_s3 + $0x30] sm:$0xff] (!%p189_p2)  ;;  %v472_v19 = vld [vmem:[%s1137_s3 + $0x38] sm:$0xff] (!%p189_p2) }
   0x9   : > { %877 = vmatpush3.bf16.msra.mxu0 (!%p189_p2), %v874_v3  ;;  %914 = vmatprep.subr.bf16.mxu1 (!%p189_p2), %v882_v8  ;;  %v890_v16 = vpack.c.bf16 (!%p189_p2), %v470_v13, %v469_v12  ;;  %v894_v21 = vpack.c.bf16 (!%p189_p2), %v472_v19, %v471_v18  ;;  %v473_v23 = vld [vmem:[%s1137_s3 + $0x40] sm:$0xff] (!%p189_p2)  ;;  %v474_v24 = vld [vmem:[%s1137_s3 + $0x48] sm:$0xff] (!%p189_p2)  ;;  %v475_v28 = vld [vmem:[%s1137_s3 + $0x50] sm:$0xff] (!%p189_p2) }
   0xa   : > { %879 = vmatprep.subr.bf16.mxu0 (!%p189_p2), %v878_v7  ;;  %922 = vmatpush3.bf16.msra.mxu1 (!%p189_p2), %v882_v8  ;;  %v898_v26 = vpack.c.bf16 (!%p189_p2), %v474_v24, %v473_v23  ;;  %v476_v29 = vld [vmem:[%s1137_s3 + $0x58] sm:$0xff] (!%p189_p2)  ;;  %v477_v33 = vld [vmem:[%s1137_s3 + $0x60] sm:$0xff] (!%p189_p2)  ;;  %v478_v34 = vld [vmem:[%s1137_s3 + $0x68] sm:$0xff] (!%p189_p2) }
   0xb   : > { %915 = vmatprep.subr.bf16.mxu1 (!%p189_p2), %v886_v11  ;;  %v902_v31 = vpack.c.bf16 (!%p189_p2), %v476_v29, %v475_v28  ;;  %v906_v36 = vpack.c.bf16 (!%p189_p2), %v478_v34, %v477_v33  ;;  %v479_v43 = vld [vmem:[%s1137_s3 + $0x70] sm:$0xff] (!%p189_p2)  ;;  %v480_v44 = vld [vmem:[%s1137_s3 + $0x78] sm:$0xff] (!%p189_p2)  ;;  %v714_v46 = vld [vmem:[%s1136_s2] ss:$0 sm:$0xff] (!%p189_p2) }
   0xc   : > { %v910_v45 = vpack.c.bf16 (!%p189_p2), %v480_v44, %v479_v43 }
   0xd   : > { %s1141_s26 = smov (!%p217_p3, %s710_s26), 31  ;;  %881 = vmatpush3.bf16.msra.mxu0 %v878_v7 }
   0xe   : > { %s711_s12 = sshll.u32 %s1141_s26, 3  ;;  %883 = vmatprep.subr.bf16.mxu0 %v882_v8  ;;  %923 = vmatpush3.bf16.msra.mxu1 %v886_v11 }
   0xf   : > { %s1022_s20 = scalar_lea.vmem %s1134_s0, %s711_s12  ;;  %916 = vmatprep.subr.bf16.mxu1 %v890_v16  ;;  %s1097_s25 = scalar_lea.vmem %s1139_s5, %s711_s12 }
  0x10   : > { %v228_v14 = vld [vmem:[%s1022_s20] sm:$0xff]  ;;  %v229_v15 = vld [vmem:[%s1022_s20 + $0x8] sm:$0xff]  ;;  %v230_v17 = vld [vmem:[%s1022_s20 + $0x10] sm:$0xff] }
  0x11   : > { %794 = vmatprep.mubr.msk.f32.mxu0 %vm255_vm0, %v228_v14  ;;  %v231_v20 = vld [vmem:[%s1022_s20 + $0x18] sm:$0xff]  ;;  %v232_v22 = vld [vmem:[%s1022_s20 + $0x20] sm:$0xff]  ;;  %v233_v25 = vld [vmem:[%s1022_s20 + $0x28] sm:$0xff] }
  0x12   : > { %795 = vmatmul.mubr.msk.f32.vlgmr.msra.gmra.mrb[0].mxu0 %vm255_vm0, %v229_v15  ;;  %924 = vmatpush3.bf16.msra.mxu1 %v890_v16  ;;  %v234_v27 = vld [vmem:[%s1022_s20 + $0x30] sm:$0xff]  ;;  %v235_v30 = vld [vmem:[%s1022_s20 + $0x38] sm:$0xff]  ;;  %v236_v32 = vld [vmem:[%s1022_s20 + $0x40] sm:$0xff] }
  0x13   : > { %797 = vmatprep.mubr.msk.f32.mxu0 %vm255_vm0, %v230_v17  ;;  %885 = vmatpush3.bf16.msra.mxu0 %v882_v8  ;;  %v237_v35 = vld [vmem:[%s1022_s20 + $0x48] sm:$0xff]  ;;  %v238_v37 = vld [vmem:[%s1022_s20 + $0x50] sm:$0xff]  ;;  %v239_v38 = vld [vmem:[%s1022_s20 + $0x58] sm:$0xff] }
  0x14   : > { %887 = vmatprep.subr.bf16.mxu0 %v886_v11  ;;  %917 = vmatprep.subr.bf16.mxu1 %v894_v21  ;;  %v240_v39 = vld [vmem:[%s1022_s20 + $0x60] sm:$0xff]  ;;  %v241_v40 = vld [vmem:[%s1022_s20 + $0x68] sm:$0xff]  ;;  %v242_v41 = vld [vmem:[%s1022_s20 + $0x70] sm:$0xff] }
  0x15   : > { %v243_v42 = vld [vmem:[%s1022_s20 + $0x78] sm:$0xff] }
  0x16   : > { %798 = vmatmul.mubr.msk.f32.gmra.mrb[2].mxu0 %vm255_vm0, %v231_v20  ;;  %925 = vmatpush3.bf16.msra.mxu1 %v894_v21 }
  0x17   : > { %800 = vmatprep.mubr.msk.f32.mxu0 %vm255_vm0, %v232_v22  ;;  %889 = vmatpush3.bf16.msra.mxu0 %v886_v11 }
  0x18   : > { %891 = vmatprep.subr.bf16.mxu0 %v890_v16  ;;  %918 = vmatprep.subr.bf16.mxu1 %v898_v26 }
  0x1a   : > { %801 = vmatmul.mubr.msk.f32.gmra.mrb[4].mxu0 %vm255_vm0, %v233_v25  ;;  %926 = vmatpush3.bf16.msra.mxu1 %v898_v26 }
  0x1b   : > { %803 = vmatprep.mubr.msk.f32.mxu0 %vm255_vm0, %v234_v27  ;;  %893 = vmatpush3.bf16.msra.mxu0 %v890_v16 }
  0x1c   : > { %895 = vmatprep.subr.bf16.mxu0 %v894_v21  ;;  %919 = vmatprep.subr.bf16.mxu1 %v902_v31 }
  0x1e   : > { %804 = vmatmul.mubr.msk.f32.gmra.mrb[6].mxu0 %vm255_vm0, %v235_v30  ;;  %927 = vmatpush3.bf16.msra.mxu1 %v902_v31 }
  0x1f   : > { %806 = vmatprep.mubr.msk.f32.mxu0 %vm255_vm0, %v236_v32  ;;  %897 = vmatpush3.bf16.msra.mxu0 %v894_v21 }
  0x20   : > { %899 = vmatprep.subr.bf16.mxu0 %v898_v26  ;;  %920 = vmatprep.subr.bf16.mxu1 %v906_v36 }
  0x22   : > { %807 = vmatmul.mubr.msk.f32.gmra.mrb[8].mxu0 %vm255_vm0, %v237_v35  ;;  %928 = vmatpush3.bf16.msra.mxu1 %v906_v36 }
  0x23   : > { %809 = vmatprep.mubr.msk.f32.mxu0 %vm255_vm0, %v238_v37  ;;  %901 = vmatpush3.bf16.msra.mxu0 %v898_v26 }
  0x24   : > { %903 = vmatprep.subr.bf16.mxu0 %v902_v31  ;;  %921 = vmatprep.subr.bf16.mxu1 %v910_v45 }
  0x26   : > { %810 = vmatmul.mubr.msk.f32.gmra.mrb[10].mxu0 %vm255_vm0, %v239_v38  ;;  %929 = vmatpush3.bf16.msra.mxu1 %v910_v45 }
  0x27   : > { %812 = vmatprep.mubr.msk.f32.mxu0 %vm255_vm0, %v240_v39  ;;  %905 = vmatpush3.bf16.msra.mxu0 %v902_v31  ;;  %v731_v31 = vld [vmem:[%s1138_s4] ss:$0 sm:$0xff] }
  0x28   : > { %907 = vmatprep.subr.bf16.mxu0 %v906_v36 }
  0x2a   : > { %813 = vmatmul.mubr.msk.f32.gmra.mrb[12].mxu0 %vm255_vm0, %v241_v40 }
  0x2b   : > { %815 = vmatprep.mubr.msk.f32.mxu0 %vm255_vm0, %v242_v41  ;;  %909 = vmatpush3.bf16.msra.mxu0 %v906_v36 }
  0x2c   : > { %911 = vmatprep.subr.bf16.mxu0 %v910_v45 }
  0x2e   : > { %816 = vmatmul.mubr.msk.f32.gmra.mrb[14].mxu0 %vm255_vm0, %v243_v42 }
  0x2f   : > { %913 = vmatpush3.bf16.msra.mxu0 %v910_v45 }
  0xe5   : > { %v796_v47 = vpop.f32.mrb[0].mxu0 }
  0xe6   : > { %v376_v48 = vadd.f32 %v796_v47, %v714_v46  ;;  %v370_v49 = vpop.f32.mrb[1].mxu0 }
  0xe7   : > { %v371_v50 = vadd.f32 %v714_v46, %v370_v49 }
  0xe8   : > { %v450_v53 = vmax.f32 %v376_v48, 0.0 }
  0xe9   : > { %v449_v51 = vmax.f32 %v371_v50, 0.0  ;;  %v799_v52 = vpop.f32.mrb[2].mxu0 }
  0xea   : > { %v386_v54 = vadd.f32 %v799_v52, %v714_v46  ;;  %v380_v55 = vpop.f32.mrb[3].mxu0 }
  0xeb   : > { %v381_v56 = vadd.f32 %v714_v46, %v380_v55  ;;  %850 = vmatprep.mubr.f32.mxu0 %v449_v51 }
  0xec   : > { %851 = vmatmul.mubr.f32.vlgmr.msra.gmra.mrb[16].mxu0 %v450_v53  ;;  %v452_v59 = vmax.f32 %v386_v54, 0.0 }
  0xed   : > { %v451_v57 = vmax.f32 %v381_v56, 0.0  ;;  %v802_v58 = vpop.f32.mrb[4].mxu0 }
  0xee   : > { %v396_v60 = vadd.f32 %v802_v58, %v714_v46  ;;  %v390_v61 = vpop.f32.mrb[5].mxu0 }
  0xef   : > { %v391_v62 = vadd.f32 %v714_v46, %v390_v61  ;;  %853 = vmatprep.mubr.f32.mxu0 %v451_v57 }
  0xf0   : > { %854 = vmatmul.mubr.f32.gmra.mrb[18].mxu0 %v452_v59  ;;  %v454_v1 = vmax.f32 %v396_v60, 0.0 }
  0xf1   : > { %v453_v63 = vmax.f32 %v391_v62, 0.0  ;;  %v805_v0 = vpop.f32.mrb[6].mxu0 }
  0xf2   : > { %v406_v2 = vadd.f32 %v805_v0, %v714_v46  ;;  %v400_v3 = vpop.f32.mrb[7].mxu0 }
  0xf3   : > { %856 = vmatprep.mubr.f32.mxu0 %v453_v63  ;;  %v401_v4 = vadd.f32 %v714_v46, %v400_v3 }
  0xf4   : > { %857 = vmatmul.mubr.f32.gmra.mrb[20].mxu0 %v454_v1  ;;  %v456_v7 = vmax.f32 %v406_v2, 0.0 }
  0xf5   : > { %v808_v5 = vpop.f32.mrb[8].mxu0  ;;  %v455_v6 = vmax.f32 %v401_v4, 0.0 }
  0xf6   : > { %v416_v8 = vadd.f32 %v808_v5, %v714_v46  ;;  %v410_v9 = vpop.f32.mrb[9].mxu0 }
  0xf7   : > { %v411_v10 = vadd.f32 %v714_v46, %v410_v9  ;;  %859 = vmatprep.mubr.f32.mxu1 %v455_v6 }
  0xf8   : > { %860 = vmatmul.mubr.f32.vlgmr.msra.gmra.mrb[0].mxu1 %v456_v7  ;;  %v458_v13 = vmax.f32 %v416_v8, 0.0 }
  0xf9   : > { %v457_v11 = vmax.f32 %v411_v10, 0.0  ;;  %v811_v12 = vpop.f32.mrb[10].mxu0 }
  0xfa   : > { %v426_v14 = vadd.f32 %v811_v12, %v714_v46  ;;  %v420_v15 = vpop.f32.mrb[11].mxu0 }
  0xfb   : > { %v421_v16 = vadd.f32 %v714_v46, %v420_v15  ;;  %862 = vmatprep.mubr.f32.mxu1 %v457_v11 }
  0xfc   : > { %863 = vmatmul.mubr.f32.gmra.mrb[2].mxu1 %v458_v13  ;;  %v460_v19 = vmax.f32 %v426_v14, 0.0 }
  0xfd   : > { %v459_v17 = vmax.f32 %v421_v16, 0.0  ;;  %v814_v18 = vpop.f32.mrb[12].mxu0 }
  0xfe   : > { %v436_v20 = vadd.f32 %v814_v18, %v714_v46  ;;  %v430_v21 = vpop.f32.mrb[13].mxu0 }
  0xff   : > { %v431_v22 = vadd.f32 %v714_v46, %v430_v21  ;;  %865 = vmatprep.mubr.f32.mxu1 %v459_v17 }
 0x100   : > { %866 = vmatmul.mubr.f32.gmra.mrb[4].mxu1 %v460_v19  ;;  %v462_v25 = vmax.f32 %v436_v20, 0.0 }
 0x101   : > { %v461_v23 = vmax.f32 %v431_v22, 0.0  ;;  %v817_v24 = vpop.f32.mrb[14].mxu0 }
 0x102   : > { %v446_v26 = vadd.f32 %v817_v24, %v714_v46  ;;  %v440_v27 = vpop.f32.mrb[15].mxu0 }
 0x103   : > { %v441_v28 = vadd.f32 %v714_v46, %v440_v27  ;;  %868 = vmatprep.mubr.f32.mxu1 %v461_v23 }
 0x104   : > { %869 = vmatmul.mubr.f32.gmra.mrb[6].mxu1 %v462_v25  ;;  %v464_v30 = vmax.f32 %v446_v26, 0.0 }
 0x105   : > { %v463_v29 = vmax.f32 %v441_v28, 0.0 }
 0x107   : > { %871 = vmatprep.mubr.f32.mxu1 %v463_v29 }
 0x108   : > { %872 = vmatmul.mubr.f32.gmra.mrb[8].mxu1 %v464_v30 }
 0x1bf   : > { %v852_v32 = vpop.f32.mrb[16].mxu0 }
 0x1c0   : > { %v560_v33 = vadd.f32 %v852_v32, %v731_v31  ;;  %v554_v34 = vpop.f32.mrb[17].mxu0 }
 0x1c1   : > { %v555_v35 = vadd.f32 %v731_v31, %v554_v34 }
 0x1c2   : > { %634 = vst.msk [vmem:[%s1097_s25 + $0x8] sm:$0xff] %vm255_vm0, %v560_v33 }
 0x1c3   : > { %633 = vst.msk [vmem:[%s1097_s25] sm:$0xff] %vm255_vm0, %v555_v35  ;;  %v855_v36 = vpop.f32.mrb[18].mxu0 }
 0x1c4   : > { %v570_v37 = vadd.f32 %v855_v36, %v731_v31  ;;  %v564_v38 = vpop.f32.mrb[19].mxu0 }
 0x1c5   : > { %v565_v39 = vadd.f32 %v731_v31, %v564_v38 }
 0x1c6   : > { %636 = vst.msk [vmem:[%s1097_s25 + $0x18] sm:$0xff] %vm255_vm0, %v570_v37 }
 0x1c7   : > { %635 = vst.msk [vmem:[%s1097_s25 + $0x10] sm:$0xff] %vm255_vm0, %v565_v39  ;;  %v858_v40 = vpop.f32.mrb[20].mxu0 }
 0x1c8   : > { %v580_v41 = vadd.f32 %v858_v40, %v731_v31  ;;  %v574_v42 = vpop.f32.mrb[21].mxu0 }
 0x1c9   : > { %v575_v43 = vadd.f32 %v731_v31, %v574_v42 }
 0x1ca   : > { %638 = vst.msk [vmem:[%s1097_s25 + $0x28] sm:$0xff] %vm255_vm0, %v580_v41 }
 0x1cb   : > { %637 = vst.msk [vmem:[%s1097_s25 + $0x20] sm:$0xff] %vm255_vm0, %v575_v43  ;;  %v861_v44 = vpop.f32.mrb[0].mxu1 }
 0x1cc   : > { %v590_v45 = vadd.f32 %v861_v44, %v731_v31  ;;  %v584_v46 = vpop.f32.mrb[1].mxu1 }
 0x1cd   : > { %v585_v47 = vadd.f32 %v731_v31, %v584_v46 }
 0x1ce   : > { %640 = vst.msk [vmem:[%s1097_s25 + $0x38] sm:$0xff] %vm255_vm0, %v590_v45 }
 0x1cf   : > { %639 = vst.msk [vmem:[%s1097_s25 + $0x30] sm:$0xff] %vm255_vm0, %v585_v47  ;;  %v864_v48 = vpop.f32.mrb[2].mxu1 }
 0x1d0   : > { %v600_v49 = vadd.f32 %v864_v48, %v731_v31  ;;  %v594_v50 = vpop.f32.mrb[3].mxu1 }
 0x1d1   : > { %v595_v51 = vadd.f32 %v731_v31, %v594_v50 }
 0x1d2   : > { %642 = vst.msk [vmem:[%s1097_s25 + $0x48] sm:$0xff] %vm255_vm0, %v600_v49 }
 0x1d3   : > { %641 = vst.msk [vmem:[%s1097_s25 + $0x40] sm:$0xff] %vm255_vm0, %v595_v51  ;;  %v867_v52 = vpop.f32.mrb[4].mxu1 }
 0x1d4   : > { %v610_v53 = vadd.f32 %v867_v52, %v731_v31  ;;  %v604_v54 = vpop.f32.mrb[5].mxu1 }
 0x1d5   : > { %v605_v55 = vadd.f32 %v731_v31, %v604_v54 }
 0x1d6   : > { %644 = vst.msk [vmem:[%s1097_s25 + $0x58] sm:$0xff] %vm255_vm0, %v610_v53 }
 0x1d7   : > { %643 = vst.msk [vmem:[%s1097_s25 + $0x50] sm:$0xff] %vm255_vm0, %v605_v55  ;;  %v870_v56 = vpop.f32.mrb[6].mxu1 }
 0x1d8   : > { %v620_v57 = vadd.f32 %v870_v56, %v731_v31  ;;  %v614_v58 = vpop.f32.mrb[7].mxu1 }
 0x1d9   : > { %v615_v59 = vadd.f32 %v731_v31, %v614_v58 }
 0x1da   : > { %646 = vst.msk [vmem:[%s1097_s25 + $0x68] sm:$0xff] %vm255_vm0, %v620_v57 }
 0x1db   : > { %645 = vst.msk [vmem:[%s1097_s25 + $0x60] sm:$0xff] %vm255_vm0, %v615_v59  ;;  %v873_v60 = vpop.f32.mrb[8].mxu1 }
 0x1dc   : > { %v630_v61 = vadd.f32 %v873_v60, %v731_v31  ;;  %v624_v62 = vpop.f32.mrb[9].mxu1 }
 0x1dd   : > { %v625_v63 = vadd.f32 %v731_v31, %v624_v62 }
 0x1de   : > { %648 = vst.msk [vmem:[%s1097_s25 + $0x78] sm:$0xff] %vm255_vm0, %v630_v61 }
 0x1df   : > { %647 = vst.msk [vmem:[%s1097_s25 + $0x70] sm:$0xff] %vm255_vm0, %v625_v63 }
 0x1e0 PF: > { %s15_s18 = sadd.s32 1, %s944_s18  }
 0x1e1   : > { %p12_p4 = scmp.ge.s32.totalorder %s15_s18, 4  }
 0x1e3   :  { %14 = sbr.rel (!%p12_p4) target bundleno = 1 (0x1), region = 70 }

</bundles_post_ra>
